<compile_context>
chip_gen: v7x
topology: tpu7x:2x2x1
jax: 0.10.0
libtpu: 0.0.40
codegen_flags: <defaults>
</compile_context>

<pallas_src>
import functools

import jax
import jax.numpy as jnp
from jax.experimental import pallas as pl
from jax.experimental.pallas import tpu as pltpu

_LANE = 128
_SUBLANE = 8
_NUM_SPLITS = 2  # leading "parallel" grid axis (both TCs on v7x; harmless elsewhere)


def _round_up(x, m):
    return ((x + m - 1) // m) * m


def _cdiv(a, b):
    return (a + b - 1) // b


def _quantile_loss_kernel(preds_ref, target_ref, out_ref, acc_ref, *, quantiles):
    """preds_ref: (Q, TILE_R, 128); target_ref: (1, TILE_R, 128); out_ref: (1, 8, 128)."""
    j = pl.program_id(1)

    @pl.when(j == 0)
    def _init():
        acc_ref[...] = jnp.zeros_like(acc_ref)

    t = target_ref[0].astype(jnp.float32)            # (TILE_R, 128)

    # Unrolled over the (small, static) quantile set; q and (q-1) are immediates.
    s = None
    for i, qv in enumerate(quantiles):
        q = float(qv)
        e = t - preds_ref[i].astype(jnp.float32)     # target - preds_i  (TILE_R, 128)
        # (1-q)*(preds-target) == (q-1)*(target-preds): only one subtraction needed.
        li = jnp.maximum(q * e, (q - 1.0) * e)
        s = li if s is None else s + li

    # Fold (TILE_R, 128) tile sum into the (8, 128) lane-parallel accumulator (pure VPU adds).
    acc_ref[...] += s.reshape(-1, _SUBLANE, _LANE).sum(axis=0)

    # Output block is resident across j (index depends only on the parallel axis);
    # keep it up to date every step (canonical accumulator pattern).
    out_ref[...] = acc_ref[...].reshape(1, _SUBLANE, _LANE)


def quantile_loss(preds, target, quantiles, *, tile_rows=2048):
    """preds: (B, Q), target: (B,), quantiles: sequence of Q floats -> scalar f32 loss.

    Inputs are streamed in their native dtype (f32 or bf16); math is f32 in-kernel.
    tile_rows: rows of 128 batch elements per grid step (multiple of 8).  2048 rows
    (= 256K batch columns) double-buffers at ~8 MiB; raise on v7x for fewer grid steps.
    """
    B, Q = preds.shape
    assert target.shape[0] == B, "preds.size(0) must equal target.size(0)"
    target = target.reshape(B)
    qtuple = tuple(float(q) for q in quantiles)
    assert len(qtuple) == Q

    # ---- layout: lane (128) on batch, sublane-dense rows, minimal zero padding ----
    R = _cdiv(B, _LANE)                                   # rows of 128 batch elements
    tile_rows = max(_SUBLANE,
                    _round_up(min(int(tile_rows), _round_up(R, _SUBLANE)), _SUBLANE))
    tiles_per_split = _cdiv(_cdiv(R, tile_rows), _NUM_SPLITS)
    num_tiles = _NUM_SPLITS * tiles_per_split
    r_pad = num_tiles * tile_rows
    b_pad = r_pad * _LANE

    # Zero padding: padded preds == padded target == 0 -> max(q*0, (q-1)*0) == 0 contribution.
    if b_pad != B:
        preds_p = jnp.pad(preds, ((0, b_pad - B), (0, 0)))
        target_p = jnp.pad(target, (0, b_pad - B))
    else:
        preds_p, target_p = preds, target
    preds_r = preds_p.T.reshape(Q, r_pad, _LANE)          # (Q, R, 128), native dtype
    target_r = target_p.reshape(1, r_pad, _LANE)          # (1, R, 128), native dtype

    kernel = functools.partial(_quantile_loss_kernel, quantiles=qtuple)

    cost = pl.CostEstimate(
        flops=5 * B * Q,
        transcendentals=0,
        bytes_accessed=int(B * Q * preds.dtype.itemsize
                           + B * target.dtype.itemsize
                           + _NUM_SPLITS * _SUBLANE * _LANE * 4),
    )

    partials = pl.pallas_call(
        kernel,
        out_shape=jax.ShapeDtypeStruct((_NUM_SPLITS, _SUBLANE, _LANE), jnp.float32),
        grid=(_NUM_SPLITS, tiles_per_split),
        in_specs=[
            pl.BlockSpec((Q, tile_rows, _LANE),
                         lambda c, j: (0, c * tiles_per_split + j, 0)),
            pl.BlockSpec((1, tile_rows, _LANE),
                         lambda c, j: (0, c * tiles_per_split + j, 0)),
        ],
        out_specs=pl.BlockSpec((1, _SUBLANE, _LANE), lambda c, j: (c, 0, 0)),
        scratch_shapes=[pltpu.VMEM((_SUBLANE, _LANE), jnp.float32)],
        compiler_params=pltpu.CompilerParams(
            dimension_semantics=("parallel", "arbitrary"),
        ),
        cost_estimate=cost,
    )(preds_r, target_r)

    # Tiny final cross-lane/core reduce + mean scaling outside the kernel.
    return jnp.sum(partials) / jnp.float32(B)


def quantile_loss_ref(preds, target, quantiles):
    """Pure-JAX reference mirroring the PyTorch forward."""
    q = jnp.asarray(quantiles, dtype=jnp.float32).reshape(1, -1)
    t = target.reshape(-1, 1).astype(jnp.float32)
    p = preds.astype(jnp.float32)
    errors = t - p
    errors2 = p - t
    per_elem = jnp.maximum((1.0 - q) * errors2, q * errors)
    return jnp.mean(jnp.sum(per_elem, axis=1))


if __name__ == "__main__":
    quantiles = (0.1, 0.5, 0.9)
    Q = len(quantiles)

    key = jax.random.PRNGKey(0)
    k1, k2, k3, k4 = jax.random.split(key, 4)

    # Small case: single tile per core-split.
    B1 = 8
    preds1 = jax.random.normal(k1, (B1, Q), dtype=jnp.float32)
    target1 = jax.random.normal(k2, (B1,), dtype=jnp.float32)
    loss1 = quantile_loss(preds1, target1, quantiles)
    jax.block_until_ready(loss1)
    ref1 = quantile_loss_ref(preds1, target1, quantiles)
    assert jnp.allclose(loss1, ref1, atol=1e-5, rtol=1e-5), (loss1, ref1)

    # Multi-tile case: exercises grid accumulation, both core-splits and row/lane padding.
    B2 = 3000
    preds2 = jax.random.normal(k3, (B2, Q), dtype=jnp.float32)
    target2 = jax.random.normal(k4, (B2,), dtype=jnp.float32)
    loss2 = quantile_loss(preds2, target2, quantiles, tile_rows=8)
    jax.block_until_ready(loss2)
    ref2 = quantile_loss_ref(preds2, target2, quantiles)
    assert jnp.allclose(loss2, ref2, atol=1e-5, rtol=1e-5), (loss2, ref2)

    # Native bf16 inputs: streamed as bf16 (half the HBM bytes), upcast inside the kernel.
    preds3 = preds2.astype(jnp.bfloat16)
    target3 = target2.astype(jnp.bfloat16)
    loss3 = quantile_loss(preds3, target3, quantiles, tile_rows=8)
    jax.block_until_ready(loss3)
    ref3 = quantile_loss_ref(preds3, target3, quantiles)
    assert jnp.allclose(loss3, ref3, atol=1e-4, rtol=1e-4), (loss3, ref3)

    print("KERNEL_OK")
</pallas_src>

<mosaic_0001>
module attributes {stable_mosaic.version = 11 : i64} {
  func.func @_quantile_loss_kernel(%arg0: i32, %arg1: i32, %arg2: memref<3x8x128xf32, #tpu.memory_space<vmem>>, %arg3: memref<1x8x128xf32, #tpu.memory_space<vmem>>, %arg4: memref<1x8x128xf32, #tpu.memory_space<vmem>>, %arg5: memref<8x128xf32, #tpu.memory_space<vmem>>) attributes {dimension_semantics = [#tpu.dimension_semantics<parallel>, #tpu.dimension_semantics<arbitrary>], iteration_bounds = array<i64: 2, 1>, scalar_prefetch = 0 : i64, scratch_operands = 1 : i64, tpu.core_type = #tpu.core_type<tc>, window_params = [{transform_indices = @transform_0, window_bounds = array<i64: 3, 8, 128>}, {transform_indices = @transform_1, window_bounds = array<i64: 1, 8, 128>}, {transform_indices = @transform_2, window_bounds = array<i64: 1, 8, 128>}]} {
    %c0_i32 = arith.constant 0 : i32
    %0 = arith.cmpi eq, %arg1, %c0_i32 : i32
    %1 = arith.extui %0 : i1 to i32
    %c0_i32_0 = arith.constant 0 : i32
    %2 = arith.cmpi ne, %1, %c0_i32_0 : i32
    scf.if %2 {
      %cst_25 = arith.constant 0.000000e+00 : f32
      %39 = vector.broadcast %cst_25 : f32 to vector<8x128xf32>
      %c0_26 = arith.constant 0 : index
      %c0_27 = arith.constant 0 : index
      %40 = vector.load %arg5[%c0_26, %c0_27] : memref<8x128xf32, #tpu.memory_space<vmem>>, vector<8x128xf32>
      tpu.vector_store %arg5[%c0_26, %c0_27], %39 {strides = array<i32>} : memref<8x128xf32, #tpu.memory_space<vmem>>, vector<8x128xf32>,
    } else {
    }
    %c0 = arith.constant 0 : index
    %c0_1 = arith.constant 0 : index
    %c0_2 = arith.constant 0 : index
    %3 = vector.load %arg3[%c0, %c0_1, %c0_2] : memref<1x8x128xf32, #tpu.memory_space<vmem>>, vector<1x8x128xf32>
    %4 = vector.shape_cast %3 : vector<1x8x128xf32> to vector<8x128xf32>
    %c0_3 = arith.constant 0 : index
    %c0_4 = arith.constant 0 : index
    %c0_5 = arith.constant 0 : index
    %5 = vector.load %arg2[%c0_3, %c0_4, %c0_5] : memref<3x8x128xf32, #tpu.memory_space<vmem>>, vector<1x8x128xf32>
    %6 = vector.shape_cast %5 : vector<1x8x128xf32> to vector<8x128xf32>
    %7 = arith.subf %4, %6 : vector<8x128xf32>
    %cst = arith.constant 1.000000e-01 : f32
    %8 = vector.broadcast %cst : f32 to vector<8x128xf32>
    %9 = arith.mulf %8, %7 : vector<8x128xf32>
    %cst_6 = arith.constant -0.899999976 : f32
    %10 = vector.broadcast %cst_6 : f32 to vector<8x128xf32>
    %11 = arith.mulf %10, %7 : vector<8x128xf32>
    %12 = arith.maximumf %9, %11 : vector<8x128xf32>
    %c1 = arith.constant 1 : index
    %c0_7 = arith.constant 0 : index
    %c0_8 = arith.constant 0 : index
    %13 = vector.load %arg2[%c1, %c0_7, %c0_8] : memref<3x8x128xf32, #tpu.memory_space<vmem>>, vector<1x8x128xf32>
    %14 = vector.shape_cast %13 : vector<1x8x128xf32> to vector<8x128xf32>
    %15 = arith.subf %4, %14 : vector<8x128xf32>
    %cst_9 = arith.constant 5.000000e-01 : f32
    %16 = vector.broadcast %cst_9 : f32 to vector<8x128xf32>
    %17 = arith.mulf %16, %15 : vector<8x128xf32>
    %cst_10 = arith.constant -5.000000e-01 : f32
    %18 = vector.broadcast %cst_10 : f32 to vector<8x128xf32>
    %19 = arith.mulf %18, %15 : vector<8x128xf32>
    %20 = arith.maximumf %17, %19 : vector<8x128xf32>
    %21 = arith.addf %12, %20 : vector<8x128xf32>
    %c2 = arith.constant 2 : index
    %c0_11 = arith.constant 0 : index
    %c0_12 = arith.constant 0 : index
    %22 = vector.load %arg2[%c2, %c0_11, %c0_12] : memref<3x8x128xf32, #tpu.memory_space<vmem>>, vector<1x8x128xf32>
    %23 = vector.shape_cast %22 : vector<1x8x128xf32> to vector<8x128xf32>
    %24 = arith.subf %4, %23 : vector<8x128xf32>
    %cst_13 = arith.constant 0.899999976 : f32
    %25 = vector.broadcast %cst_13 : f32 to vector<8x128xf32>
    %26 = arith.mulf %25, %24 : vector<8x128xf32>
    %cst_14 = arith.constant -1.000000e-01 : f32
    %27 = vector.broadcast %cst_14 : f32 to vector<8x128xf32>
    %28 = arith.mulf %27, %24 : vector<8x128xf32>
    %29 = arith.maximumf %26, %28 : vector<8x128xf32>
    %30 = arith.addf %21, %29 : vector<8x128xf32>
    %c0_15 = arith.constant 0 : index
    %c0_16 = arith.constant 0 : index
    %31 = vector.load %arg5[%c0_15, %c0_16] : memref<8x128xf32, #tpu.memory_space<vmem>>, vector<8x128xf32>
    %32 = vector.shape_cast %30 : vector<8x128xf32> to vector<1x8x128xf32>
    %cst_17 = arith.constant dense<0.000000e+00> : vector<8x128xf32>
    %33 = vector.multi_reduction <add>, %32, %cst_17 [0] : vector<1x8x128xf32> to vector<8x128xf32>
    %34 = arith.addf %31, %33 : vector<8x128xf32>
    %c0_18 = arith.constant 0 : index
    %c0_19 = arith.constant 0 : index
    %35 = vector.load %arg5[%c0_18, %c0_19] : memref<8x128xf32, #tpu.memory_space<vmem>>, vector<8x128xf32>
    tpu.vector_store %arg5[%c0_18, %c0_19], %34 {strides = array<i32>} : memref<8x128xf32, #tpu.memory_space<vmem>>, vector<8x128xf32>,
    %c0_20 = arith.constant 0 : index
    %c0_21 = arith.constant 0 : index
    %36 = vector.load %arg5[%c0_20, %c0_21] : memref<8x128xf32, #tpu.memory_space<vmem>>, vector<8x128xf32>
    %37 = vector.shape_cast %36 : vector<8x128xf32> to vector<1x8x128xf32>
    %c0_22 = arith.constant 0 : index
    %c0_23 = arith.constant 0 : index
    %c0_24 = arith.constant 0 : index
    %38 = vector.load %arg4[%c0_22, %c0_23, %c0_24] : memref<1x8x128xf32, #tpu.memory_space<vmem>>, vector<1x8x128xf32>
    tpu.vector_store %arg4[%c0_22, %c0_23, %c0_24], %37 {strides = array<i32>} : memref<1x8x128xf32, #tpu.memory_space<vmem>>, vector<1x8x128xf32>,
    return
  }
  func.func @transform_0(%arg0: i32, %arg1: i32) -> (i32, i32, i32) {
    %c1_i32 = arith.constant 1 : i32
    %0 = arith.muli %arg0, %c1_i32 : i32
    %1 = arith.addi %0, %arg1 : i32
    %c0_i32 = arith.constant 0 : i32
    %c0_i32_0 = arith.constant 0 : i32
    %c0_i32_1 = arith.constant 0 : i32
    return %c0_i32, %1, %c0_i32_0 : i32, i32, i32
  }
  func.func @transform_1(%arg0: i32, %arg1: i32) -> (i32, i32, i32) {
    %c1_i32 = arith.constant 1 : i32
    %0 = arith.muli %arg0, %c1_i32 : i32
    %1 = arith.addi %0, %arg1 : i32
    %c0_i32 = arith.constant 0 : i32
    %c0_i32_0 = arith.constant 0 : i32
    %c0_i32_1 = arith.constant 0 : i32
    return %c0_i32, %1, %c0_i32_0 : i32, i32, i32
  }
  func.func @transform_2(%arg0: i32, %arg1: i32) -> (i32, i32, i32) {
    %c0_i32 = arith.constant 0 : i32
    %c0_i32_0 = arith.constant 0 : i32
    %c0_i32_1 = arith.constant 0 : i32
    return %arg0, %c0_i32, %c0_i32_0 : i32, i32, i32
  }
}

</mosaic_0001>

<bundles_post_ra>
// kernel: tpu_custom_call.1
= control target key start
LH: loop header
LB: loop body
LE: loop exit
PB: predicated region body
PF: predicated region fallthrough
CT: control target
= control target key end

     0   :  { %7 = vsyncpa [#allocation4], 0  ;;  %s839_s0 = inlined_call_operand.hbm [shape: f32[3,16,128], index: 0, kind: input, shape index: {}]   ;;  %s840_s1 = inlined_call_operand.hbm [shape: f32[1,16,128], index: 1, kind: input, shape index: {}]   ;;  %s841_s2 = inlined_call_operand.hbm [shape: f32[2,8,128], index: 2, kind: output, shape index: {}]  }
   0x1   :  { %9 = vsyncpa [#allocation4 + $0x1], 0 }
   0x2   :  { %10 = vsyncpa [#allocation7], 0 }
   0x3   :  { %12 = vsyncpa [#allocation7 + $0x1], 0 }
   0x4   :  { %13 = vsyncpa [#allocation5], 0 }
   0x5   :  { %15 = vsyncpa [#allocation5 + $0x1], 0  ;;  %s623_s9 = smov 0   ;;  %s625_s10 = smov 0  }
   0x6   :  { %s627_s11 = smov 0   ;;  %s629_s12 = smov 0  }
   0x7   :  { %s631_s13 = smov 0   ;;  %s633_s14 = smov 0  }
   0x8 LB: > { %s366_s15 = sadd.s32 4294967295, %s600_s14   ;;  %s367_s16 = sadd.s32 4294967294, %s600_s14   ;;  %s600_s14 = sphi %s633_s14, %s21_s14   ;;  %s596_s13 = sphi %s631_s13, %s859_s13   ;;  %s592_s12 = sphi %s629_s12, %s858_s12   ;;  %s588_s11 = sphi %s627_s11, %s857_s11   ;;  %s584_s10 = sphi %s625_s10, %s856_s10   ;;  %s580_s9 = sphi %s623_s9, %s855_s9  }
   0x9   : > { %s33_s17 = sadd.s32 1, %s596_s13  ;;  %s42_s18 = sadd.s32 1, %s588_s11 }
   0xa   : > { %p35_p0 = scmp.ge.s32.totalorder %s33_s17, 2  ;;  %p49_p1 = scmp.ne.s32.totalorder %s588_s11, %s584_s10 }
   0xb   : > { %p50_p2 = scmp.eq.s32.totalorder %s600_s14, 0  ;;  %p55_p3 = scmp.ne.s32.totalorder %s584_s10, %s580_s9 }
   0xc   : > { %s861_s17 = smov (%p35_p0, %s33_s17), 0  ;;  %p56_p5 = scmp.eq.s32.totalorder %s366_s15, 0 }
   0xd   : > { %p664_p4 = por %p50_p2, %p49_p1  ;;  %s39_s20 = ssub.s32 %s596_s13, %s861_s17 }
   0xe   : > { %p107_p6 = scmp.eq.s32.totalorder %s366_s15, 1  ;;  %p40_p7 = scmp.eq.s32.totalorder %s39_s20, 0 }
   0xf   : > { %p670_p8 = por %p56_p5, %p55_p3  ;;  %p113_p10 = scmp.eq.s32.totalorder %s367_s16, 1 }
  0x10   : > { %p674_p9 = por %p107_p6, %p49_p1  ;;  %p401_p13 = scmp.lt.s32.totalorder %s600_s14, 2 }
  0x11   : > { %s845_s21 = scalar_select %p670_p8, 1, 0 }
  0x12   : > { %s846_s22 = scalar_select %p674_p9, 1, 0 }
  0x13   : > { %s679_s23 = scalar_select %p40_p7, %s588_s11, %s42_s18  }
  0x14   : > { %p681_p11 = por %p113_p10, %p55_p3  ;;  %s688_s25 = sand.u32 1, %s588_s11  }
  0x15   : > { %s382_s26 = smul.u32 24, %s688_s25  ;;  %s370_s27 = sshll.u32 %s596_s13, 7 }
  0x16   : > { %s847_s24 = scalar_select %p681_p11, 1, 0 }
  0x17   : > { %p694_p0 = pnand %p401_p13, %p664_p4  ;;  %s703_s3 = scalar_lea.hbm %s839_s0, %s370_s27 }
  0x18   : > { %s137_s4 = scalar_lea.vmem [#allocation3], %s382_s26  ;;  %s134_s6 = scalar_lea.sflag [#allocation4], %s688_s25 }
  0x19   : > { %s144_s5 = sshll.u32 %s137_s4, 4  ;;  %s454_s7 = scalar_lea.hbm %s703_s3, 384  ;;  %s705_s5 = int_to_ptr.vmem [resolvable:$true] %s144_s5 }
  0x1a   : > { %p455_p1 = scmp.ne.s32.totalorder %s703_s3, %s454_s7  ;;  %p456_p2 = pneg %p694_p0 }
  0x1b   : > { %s459_s16 = scalar_lea.hbm %s839_s0, 768  ;;  %p460_p5 = scmp.lt.u32.totalorder %s703_s3, %s839_s0 }
  0x1c   : > { %p457_p3 = pnand %p456_p2, %p455_p1  ;;  %p461_p6 = scmp.lt.u32.totalorder %s459_s16, %s454_s7 }
  0x1d   : > { %p463_p10 = scmp.lt.u32.totalorder %s454_s7, %s703_s3 }
  0x1e   : > { %p458_p4 = pneg %p457_p3  ;;  %p462_p7 = por %p461_p6, %p460_p5 }
  0x20   : > { %p464_p13 = por %p463_p10, %p462_p7 }
  0x22   : > { %p465_p12 = pnand %p464_p13, %p458_p4 }
  0x24   : > { %468 = shalt.err (!%p465_p12)
}
  0x25   : > { %s469_s20 = scalar_lea.vmem %s705_s5, 384  ;;  %s602_s26 = smov [#allocation3]  }
  0x26   : > { %p470_p1 = scmp.ne.s32.totalorder %s705_s5, %s469_s20  ;;  %s474_s29 = sshll.u32 %s602_s26, 4  ;;  %s475_s29 = int_to_ptr.vmem [resolvable:$false] %s474_s29 }
  0x27   : > { %s476_s30 = scalar_lea.vmem %s475_s29, 768  ;;  %p477_p9 = scmp.lt.s32.totalorder %s705_s5, %s475_s29 }
  0x28   : > { %p472_p3 = pnand %p470_p1, %p456_p2  ;;  %p478_p5 = scmp.lt.s32.totalorder %s476_s30, %s469_s20 }
  0x2a   : > { %p473_p11 = pneg %p472_p3  ;;  %p479_p6 = por %p478_p5, %p477_p9 }
  0x2c   : > { %p480_p7 = pnand %p479_p6, %p473_p11 }
  0x2e   : > { %483 = shalt.err (!%p480_p7)
}
  0x2f   : > { %s603_s4 = smov 256   ;;  %s604_s7 = smov 128  }
  0x30   : > { %s605_s8 = smov 8   ;;  %p373_p12 = scmp.ge.s32.totalorder %s600_s14, 1 }
  0x31   : > { %393 = dma.hbm_to_vmem [thread:$0]  (!%p694_p0), %s703_s3, 384, %s705_s5, %s134_s6, %s603_s4, %s604_s7, %s605_s8  }
  0x32   : > { %p171_p9 = scmp.lt.s32.totalorder %s600_s14, 3  ;;  %s371_s15 = sshll.u32 %s688_s25, 3 }
  0x33   : > { %s747_s20 = scalar_lea.hbm %s840_s1, %s370_s27  ;;  %s158_s26 = scalar_lea.vmem [#allocation6], %s371_s15 }
  0x34   : > { %p738_p11 = pnand %p373_p12, %p171_p9  ;;  %s166_s29 = sshll.u32 %s158_s26, 4  ;;  %s167_s29 = int_to_ptr.vmem [resolvable:$true] %s166_s29 }
  0x35   : > { %s155_s3 = scalar_lea.sflag [#allocation7], %s688_s25  ;;  %s484_s5 = scalar_lea.hbm %s747_s20, 128 }
  0x36   : > { %s849_s16 = scalar_select %p738_p11, 1, 0 }
  0x37   : > { %p485_p4 = scmp.ne.s32.totalorder %s747_s20, %s484_s5  ;;  %s489_s4 = scalar_lea.hbm %s840_s1, 256 }
  0x38   : > { %p490_p1 = scmp.lt.u32.totalorder %s747_s20, %s840_s1  ;;  %p491_p3 = scmp.lt.u32.totalorder %s489_s4, %s484_s5 }
  0x39   : > { %p487_p10 = pnand %p485_p4, %p456_p2  ;;  %p493_p6 = scmp.lt.u32.totalorder %s484_s5, %s747_s20 }
  0x3a   : > { %p492_p5 = por %p491_p3, %p490_p1 }
  0x3b   : > { %p488_p13 = pneg %p487_p10 }
  0x3c   : > { %p494_p7 = por %p493_p6, %p492_p5 }
  0x3e   : > { %p495_p12 = pnand %p494_p7, %p488_p13 }
  0x40   : > { %498 = shalt.err (!%p495_p12)
}
  0x41   : > { %s499_s25 = scalar_lea.vmem %s167_s29, 128  ;;  %s606_s8 = smov [#allocation6]  }
  0x42   : > { %p500_p9 = scmp.ne.s32.totalorder %s167_s29, %s499_s25  ;;  %s504_s15 = sshll.u32 %s606_s8, 4  ;;  %s505_s15 = int_to_ptr.vmem [resolvable:$false] %s504_s15 }
  0x43   : > { %s506_s18 = scalar_lea.vmem %s505_s15, 256  ;;  %p507_p8 = scmp.lt.s32.totalorder %s167_s29, %s505_s15 }
  0x44   : > { %p502_p4 = pnand %p500_p9, %p456_p2  ;;  %p508_p11 = scmp.lt.s32.totalorder %s506_s18, %s499_s25 }
  0x46   : > { %p503_p10 = pneg %p502_p4  ;;  %p509_p1 = por %p508_p11, %p507_p8 }
  0x48   : > { %p510_p3 = pnand %p509_p1, %p503_p10 }
  0x4a   : > { %513 = shalt.err (!%p510_p3)
}
  0x4b   : > { %396 = dma.hbm_to_vmem [thread:$0]  (!%p694_p0), %s747_s20, 128, %s167_s29, %s155_s3  }
  0x4c   : > { %p850_p13 = scmp.ne.s32.totalorder %s849_s16, 0 }
  0x4d   : > { %s772_s19 = sand.u32 (!%p850_p13), 1, %s584_s10   ;;  %p851_p2 = scmp.ne.s32.totalorder (!%p850_p13), %s845_s21, 0 }
  0x4e   : > { %175 = sbr.rel (%p850_p13) target bundleno = 116 (0x74), region = 28  ;;  %s178_s5 = scalar_lea.sflag (!%p850_p13), [#allocation4], %s772_s19 }
  0x4f   : > { %s383_s26 = smul.u32 (!%p850_p13), 24, %s772_s19 }
  0x51   : > { %s181_s6 = scalar_lea.vmem (!%p850_p13), [#allocation3], %s383_s26 }
  0x55   : > { %567 = dma.done.wait (%p851_p2), %s178_s5, 384  }
  0x56   : > { %569 = vsyncadd (%p851_p2), %s178_s5, 4294966912  ;;  %s374_s28 = sshll.u32 %s772_s19, 3  ;;  %s187_s16 = scalar_lea.sflag [#allocation7], %s772_s19 }
  0x57   : > { %s190_s20 = scalar_lea.vmem [#allocation6], %s374_s28 }
  0x58   : > { %571 = dma.done.wait (%p851_p2), %s187_s16, 128  }
  0x59   : > { %573 = vsyncadd (%p851_p2), %s187_s16, 4294967168  ;;  %v223_v0 = vld [vmem:[%s190_s20] sm:$0xff]  ;;  %v376_v2 = vld [vmem:[%s181_s6 + $0x8] sm:$0xff]  ;;  %s215_s21 = scalar_lea.vmem [#allocation8], %s374_s28  ;;  %s379_s3 = sshll.u32 %s592_s12, 7 }
  0x5a   : > { %v224_v1 = vld [vmem:[%s181_s6] sm:$0xff]  ;;  %v231_v4 = vsub.f32 %v223_v0, %v376_v2  ;;  %v377_v5 = vld [vmem:[%s181_s6 + $0x10] sm:$0xff]  ;;  %s263_s29 = sshll.u32 %s215_s21, 4  ;;  %s792_s27 = scalar_lea.hbm %s841_s2, %s379_s3  ;;  %s787_s29 = int_to_ptr.vmem [resolvable:$true] %s263_s29 }
  0x5b   : > { %v225_v3 = vsub.f32 %v223_v0, %v224_v1  ;;  %v238_v6 = vsub.f32 %v223_v0, %v377_v5  ;;  %s250_s7 = scalar_lea.sflag [#allocation5], %s772_s19  ;;  %s514_s25 = scalar_lea.vmem %s787_s29, 128 }
  0x5c   : > { %v232_v9 = vmul.f32 0.5, %v231_v4  ;;  %v233_v10 = vmul.f32 -0.5, %v231_v4  ;;  %p515_p8 = scmp.ne.s32.totalorder %s787_s29, %s514_s25  ;;  %p852_p0 = scmp.ne.s32.totalorder %s846_s22, 0 }
  0x5d   : > { %v226_v7 = vmul.f32 0.1, %v225_v3  ;;  %v227_v8 = vmul.f32 -0.9, %v225_v3  ;;  %v239_v11 = vmul.f32 0.9, %v238_v6 }
  0x5e   : > { %v240_v12 = vmul.f32 -0.1, %v238_v6  ;;  %v234_v14 = vmax.f32 %v232_v9, %v233_v10  ;;  %p516_p11 = pnand %p515_p8, %p852_p0  ;;  %s607_s12 = smov [#allocation8]  }
  0x5f   : > { %v228_v13 = vmax.f32 %v226_v7, %v227_v8  ;;  %s518_s8 = sshll.u32 %s607_s12, 4  ;;  %s519_s8 = int_to_ptr.vmem [resolvable:$false] %s518_s8 }
  0x60   : > { %v241_v15 = vmax.f32 %v239_v11, %v240_v12  ;;  %p517_p5 = pneg %p516_p11  ;;  %s520_s15 = scalar_lea.vmem %s519_s8, 256 }
  0x61   : > { %v235_v16 = vadd.f32 %v234_v14, %v228_v13  ;;  %p521_p6 = scmp.lt.s32.totalorder %s787_s29, %s519_s8  ;;  %p522_p7 = scmp.lt.s32.totalorder %s520_s15, %s514_s25 }
  0x63   : > { %v242_v17 = vadd.f32 %v241_v15, %v235_v16  ;;  %p523_p12 = por %p522_p7, %p521_p6 }
  0x65   : > { %248 = vst [vmem:[%s215_s21] sm:$0xff] %v242_v17  ;;  %p524_p9 = pnand %p523_p12, %p517_p5 }
  0x67   : > { %527 = shalt.err (!%p524_p9)
}
  0x68   : > { %s528_s18 = scalar_lea.hbm %s792_s27, 128  ;;  %s532_s5 = scalar_lea.hbm %s841_s2, 256 }
  0x69   : > { %p529_p4 = scmp.ne.s32.totalorder %s792_s27, %s528_s18  ;;  %p533_p3 = scmp.lt.u32.totalorder %s792_s27, %s841_s2 }
  0x6a   : > { %p534_p13 = scmp.lt.u32.totalorder %s532_s5, %s528_s18  ;;  %p536_p8 = scmp.lt.u32.totalorder %s528_s18, %s792_s27 }
  0x6b   : > { %p530_p10 = pnand %p529_p4, %p852_p0 }
  0x6c   : > { %p535_p2 = por %p534_p13, %p533_p3 }
  0x6d   : > { %p531_p1 = pneg %p530_p10 }
  0x6e   : > { %p537_p11 = por %p536_p8, %p535_p2 }
  0x70   : > { %p538_p5 = pnand %p537_p11, %p531_p1 }
  0x72   : > { %541 = shalt.err (!%p538_p5)
}
  0x73   : > { %388 = dma.vmem_to_hbm [thread:$0]  (%p852_p0), %s787_s29, 128, %s792_s27, %s250_s7  }
  0x74 PF: > { %s275_s16 = sand.u32 1, %s580_s9   ;;  %p853_p6 = scmp.ne.s32.totalorder %s847_s24, 0 }
  0x75   : > { %p854_p7 = scmp.ge.s32.totalorder %s600_s14, 2  ;;  %s276_s20 = scalar_lea.sflag [#allocation5], %s275_s16 }
  0x77   : > { %p398_p12 = pnand %p854_p7, %p853_p6 }
  0x79   : > { %575 = dma.done.wait (!%p398_p12), %s276_s20, 128  }
  0x7a   : > { %577 = vsyncadd (!%p398_p12), %s276_s20, 4294967168  ;;  %s21_s14 = sadd.s32 1, %s600_s14   ;;  %s855_s9 = smov %s584_s10 }
  0x7b   : > { %p18_p9 = scmp.ge.s32.totalorder %s21_s14, 4   ;;  %s856_s10 = smov %s588_s11 }
  0x7c   : > { %s857_s11 = smov %s679_s23  ;;  %s858_s12 = smov %s596_s13 }
  0x7d   : > { %s859_s13 = smov %s861_s17  ;;  %20 = sbr.rel (!%p18_p9) target bundleno = 8 (0x8), region = 92 }
  0x84   :  { %281 = vsyncpa [#allocation4], 1 }
  0x85   :  { %283 = vsyncpa [#allocation4 + $0x1], 1 }
  0x86   :  { %284 = vsyncpa [#allocation7], 1 }
  0x87   :  { %286 = vsyncpa [#allocation7 + $0x1], 1 }
  0x88   :  { %287 = vsyncpa [#allocation5], 1 }
  0x89   :  { %289 = vsyncpa [#allocation5 + $0x1], 1 }

</bundles_post_ra>
